<compile_context>
chip_gen: v6e
topology: v6e:2x2x1
jax: 0.10.0
libtpu: 0.0.40
codegen_flags: <defaults>
</compile_context>

<pallas_src>
import functools

import jax
import jax.numpy as jnp
from jax.experimental import pallas as pl
from jax.experimental.pallas import tpu as pltpu


OUT_FEATURES = 6   # true Qnet action dimension
OUT_PAD = 8        # fc4 outputs padded to the 8-row sublane granularity


def _round_up(n, m):
    return ((n + m - 1) // m) * m


def _default_tuning():
    """Chip-dependent defaults (resolved outside jit, passed as statics)."""
    kind = jax.devices()[0].device_kind.lower()
    # Pre-v6 chips have no bf16 VPU/EUP -> keep activations in f32 there.
    act_dtype = (jnp.float32
                 if any(v in kind for v in ("v2", "v3", "v4", "v5"))
                 else jnp.bfloat16)
    # v7x has 2 TensorCores sharing the grid -> want >= 2 tiles when possible.
    min_tiles = 2 if "v7" in kind else 1
    return act_dtype, min_tiles


def _choose_tiling(batch, block_m, min_tiles):
    """Pick (batch tile, padded batch).

    Multi-tile grids use a 128-aligned tile (unmasked lane-dense output
    stores) and an even tile count (v7x core split).  Single-tile grids only
    pad the batch to the 8-row sublane granularity.
    """
    n_tiles = -(-batch // block_m)                  # ceil division
    if batch >= 2 * 128:                            # big enough to split
        n_tiles = max(n_tiles, min_tiles)
    if n_tiles <= 1:
        tm = _round_up(batch, 8)
        return tm, tm
    if n_tiles % 2:
        n_tiles += 1
    tm = _round_up(-(-batch // n_tiles), 128)
    return tm, n_tiles * tm


def qnet_kernel(x_ref,
                w1_ref, b1_ref,
                w2_ref, b2_ref,
                w3_ref, b3_ref,
                w4_ref, b4_ref,
                o_ref, *, act_dtype):
    """One (TM, 4) batch tile -> one (8, TM) lane-dense transposed output."""
    x = x_ref[...].astype(jnp.bfloat16)

    def sigmoid(z_f32):
        # exp rides the EUP in act_dtype (bf16 on v6e/v7x, f32 on older
        # chips); the approximate reciprocal also rides the EUP (vrcp) and
        # skips the VALU Newton refinement of an exact divide.
        e = jnp.exp(-(z_f32.astype(act_dtype)))
        s = pl.reciprocal(1.0 + e.astype(jnp.float32), approx=True)
        return s.astype(jnp.bfloat16)          # next matmul takes bf16 anyway

    h = sigmoid(jnp.dot(x, w1_ref[...],
                        preferred_element_type=jnp.float32) + b1_ref[...])
    h = sigmoid(jnp.dot(h, w2_ref[...],
                        preferred_element_type=jnp.float32) + b2_ref[...])
    h = sigmoid(jnp.dot(h, w3_ref[...],
                        preferred_element_type=jnp.float32) + b3_ref[...])

    # fc4 computed transposed: w4 (8, 128) contracted with h (TM, 128) on the
    # 128-feature axis -> (8, TM).  The batch axis maps to lanes, so the store
    # is lane-dense and the HBM writeback is only 32 B/row.
    out = jax.lax.dot_general(
        w4_ref[...], h,
        dimension_numbers=(((1,), (1,)), ((), ())),
        preferred_element_type=jnp.float32) + b4_ref[...]
    o_ref[...] = out


@functools.partial(jax.jit, static_argnames=("block_m", "act_dtype", "min_tiles"))
def _qnet_forward_impl(x, params, *, block_m, act_dtype, min_tiles):
    B = x.shape[0]
    tm, b_pad = _choose_tiling(B, block_m, min_tiles)
    if b_pad != B:
        x = jnp.pad(x, ((0, b_pad - B), (0, 0)))
    grid = (b_pad // tm,)

    w1, b1 = params["w1"], params["b1"]
    w2, b2 = params["w2"], params["b2"]
    w3, b3 = params["w3"], params["b3"]
    # fc4 in (out, in) layout, zero-padded from 6 to 8 output rows.
    w4 = jnp.pad(jnp.transpose(params["w4"]),
                 ((0, OUT_PAD - OUT_FEATURES), (0, 0)))          # (8, 128) bf16
    b4 = jnp.pad(jnp.reshape(params["b4"], (OUT_FEATURES, 1)),
                 ((0, OUT_PAD - OUT_FEATURES), (0, 0)))          # (8, 1)  f32

    def resident(a):
        # Full-array block, constant block index -> DMA'd once, VMEM-resident.
        return pl.BlockSpec(a.shape, lambda i: (0, 0))

    out = pl.pallas_call(
        functools.partial(qnet_kernel, act_dtype=act_dtype),
        out_shape=jax.ShapeDtypeStruct((OUT_PAD, b_pad), jnp.float32),
        grid=grid,
        in_specs=[
            pl.BlockSpec((tm, 4), lambda i: (i, 0)),   # x: tiled over batch
            resident(w1), resident(b1),
            resident(w2), resident(b2),
            resident(w3), resident(b3),
            resident(w4), resident(b4),
        ],
        out_specs=pl.BlockSpec((OUT_PAD, tm), lambda i: (0, i)),
        compiler_params=pltpu.CompilerParams(
            dimension_semantics=("parallel",),   # batch tiles shard over v7x TCs
            vmem_limit_bytes=32 << 20,
        ),
    )(x, w1, b1, w2, b2, w3, b3, w4, b4)

    # Cheap: only 6 * B f32 touched (vs. re-reading a padded 128-wide slab).
    return out[:OUT_FEATURES, :B].T


def qnet_forward(x, params, *, block_m=512, act_dtype=None):
    """x: (B, 4) float32 -> (B, 6) float32 Q-values."""
    default_act, min_tiles = _default_tuning()
    if act_dtype is None:
        act_dtype = default_act
    return _qnet_forward_impl(x, params, block_m=block_m,
                              act_dtype=act_dtype, min_tiles=min_tiles)


def init_params(key):
    """Deterministic init matching the PyTorch layer shapes.

    PyTorch nn.Linear(in,out) has W:(out,in), b:(out,).  We store W transposed
    (in, out) in bfloat16 (f32 accumulation in the kernel) and b as (1, out)
    f32, using uniform(-1/sqrt(in), 1/sqrt(in)) like PyTorch's default init.
    """
    dims = [(4, 256), (256, 128), (128, 128), (128, OUT_FEATURES)]
    params = {}
    keys = jax.random.split(key, 2 * len(dims))
    for i, (din, dout) in enumerate(dims):
        bound = 1.0 / jnp.sqrt(jnp.float32(din))
        w = jax.random.uniform(keys[2 * i], (din, dout), jnp.float32,
                               minval=-bound, maxval=bound)
        b = jax.random.uniform(keys[2 * i + 1], (1, dout), jnp.float32,
                               minval=-bound, maxval=bound)
        params[f"w{i + 1}"] = w.astype(jnp.bfloat16)
        params[f"b{i + 1}"] = b
    return params


def qnet_reference(x, params):
    """Pure-JAX reference (same bf16 weights, f32 accumulation, exact sigmoid)."""
    def dot(a, w):
        return jnp.dot(a.astype(jnp.bfloat16), w,
                       preferred_element_type=jnp.float32)

    h = jax.nn.sigmoid(dot(x, params["w1"]) + params["b1"])
    h = jax.nn.sigmoid(dot(h, params["w2"]) + params["b2"])
    h = jax.nn.sigmoid(dot(h, params["w3"]) + params["b3"])
    return dot(h, params["w4"]) + params["b4"]


if __name__ == "__main__":
    key = jax.random.PRNGKey(0)
    pkey, xkey1, xkey2 = jax.random.split(key, 3)
    params = init_params(pkey)

    # Tiny batch of 4-dim observations (single grid step, tm = 8).
    B_small = 8
    x_small = jax.random.normal(xkey1, (B_small, 4), jnp.float32)
    out_small = jax.block_until_ready(qnet_forward(x_small, params))
    ref_small = qnet_reference(x_small, params)
    assert out_small.shape == (B_small, OUT_FEATURES)
    assert jnp.allclose(out_small, ref_small, atol=2e-2, rtol=2e-2)

    # Non-multiple batch with a small tile so the multi-tile path
    # (128-aligned tile, even grid, batch padding) is exercised: grid=(4,).
    B_big = 300
    x_big = jax.random.normal(xkey2, (B_big, 4), jnp.float32)
    out_big = jax.block_until_ready(qnet_forward(x_big, params, block_m=128))
    ref_big = qnet_reference(x_big, params)
    assert out_big.shape == (B_big, OUT_FEATURES)
    assert jnp.allclose(out_big, ref_big, atol=2e-2, rtol=2e-2)

    print("KERNEL_OK")
</pallas_src>

<mosaic_0001>
module attributes {stable_mosaic.version = 11 : i64} {
  func.func @qnet_kernel(%arg0: i32, %arg1: memref<8x4xf32, #tpu.memory_space<vmem>>, %arg2: memref<4x256xbf16, #tpu.memory_space<vmem>>, %arg3: memref<1x256xf32, #tpu.memory_space<vmem>>, %arg4: memref<256x128xbf16, #tpu.memory_space<vmem>>, %arg5: memref<1x128xf32, #tpu.memory_space<vmem>>, %arg6: memref<128x128xbf16, #tpu.memory_space<vmem>>, %arg7: memref<1x128xf32, #tpu.memory_space<vmem>>, %arg8: memref<8x128xbf16, #tpu.memory_space<vmem>>, %arg9: memref<8x1xf32, #tpu.memory_space<vmem>>, %arg10: memref<8x8xf32, #tpu.memory_space<vmem>>) attributes {dimension_semantics = [#tpu.dimension_semantics<parallel>], iteration_bounds = array<i64: 1>, scalar_prefetch = 0 : i64, scratch_operands = 0 : i64, tpu.core_type = #tpu.core_type<tc>, window_params = [{transform_indices = @transform_0, window_bounds = array<i64: 8, 4>}, {pipeline_mode = #tpu.pipeline_mode<synchronous>, transform_indices = @transform_1, window_bounds = array<i64: 4, 256>}, {pipeline_mode = #tpu.pipeline_mode<synchronous>, transform_indices = @transform_2, window_bounds = array<i64: 1, 256>}, {pipeline_mode = #tpu.pipeline_mode<synchronous>, transform_indices = @transform_3, window_bounds = array<i64: 256, 128>}, {pipeline_mode = #tpu.pipeline_mode<synchronous>, transform_indices = @transform_4, window_bounds = array<i64: 1, 128>}, {pipeline_mode = #tpu.pipeline_mode<synchronous>, transform_indices = @transform_5, window_bounds = array<i64: 128, 128>}, {pipeline_mode = #tpu.pipeline_mode<synchronous>, transform_indices = @transform_6, window_bounds = array<i64: 1, 128>}, {pipeline_mode = #tpu.pipeline_mode<synchronous>, transform_indices = @transform_7, window_bounds = array<i64: 8, 128>}, {pipeline_mode = #tpu.pipeline_mode<synchronous>, transform_indices = @transform_8, window_bounds = array<i64: 8, 1>}, {transform_indices = @transform_9, window_bounds = array<i64: 8, 8>}]} {
    %c0 = arith.constant 0 : index
    %c0_0 = arith.constant 0 : index
    %0 = vector.load %arg1[%c0, %c0_0] : memref<8x4xf32, #tpu.memory_space<vmem>>, vector<8x4xf32>
    %1 = arith.truncf %0 : vector<8x4xf32> to vector<8x4xbf16>
    %c0_1 = arith.constant 0 : index
    %c0_2 = arith.constant 0 : index
    %2 = vector.load %arg2[%c0_1, %c0_2] : memref<4x256xbf16, #tpu.memory_space<vmem>>, vector<4x256xbf16>
    %cst = arith.constant dense<0.000000e+00> : vector<8x256xf32>
    %3 = tpu.matmul %1, %2, %cst {dimension_numbers = #tpu.dot_dimension_numbers<[1], [0], [0], [1], [0, 0, 1, 1], [], []>} : vector<8x4xbf16>, vector<4x256xbf16>, vector<8x256xf32> -> vector<8x256xf32>
    %c0_3 = arith.constant 0 : index
    %c0_4 = arith.constant 0 : index
    %4 = vector.load %arg3[%c0_3, %c0_4] : memref<1x256xf32, #tpu.memory_space<vmem>>, vector<1x256xf32>
    %5 = vector.broadcast %4 : vector<1x256xf32> to vector<8x256xf32>
    %6 = arith.addf %3, %5 : vector<8x256xf32>
    %7 = arith.truncf %6 : vector<8x256xf32> to vector<8x256xbf16>
    %cst_5 = arith.constant 0.000000e+00 : bf16
    %8 = vector.broadcast %cst_5 : bf16 to vector<8x256xbf16>
    %9 = arith.subf %8, %7 : vector<8x256xbf16>
    %10 = math.exp %9 : vector<8x256xbf16>
    %11 = arith.extf %10 : vector<8x256xbf16> to vector<8x256xf32>
    %cst_6 = arith.constant 1.000000e+00 : f32
    %12 = vector.broadcast %cst_6 : f32 to vector<8x256xf32>
    %13 = arith.addf %12, %11 : vector<8x256xf32>
    %14 = tpu.reciprocal %13 {approx = true} : vector<8x256xf32> -> vector<8x256xf32>
    %15 = arith.truncf %14 : vector<8x256xf32> to vector<8x256xbf16>
    %c0_7 = arith.constant 0 : index
    %c0_8 = arith.constant 0 : index
    %16 = vector.load %arg4[%c0_7, %c0_8] : memref<256x128xbf16, #tpu.memory_space<vmem>>, vector<256x128xbf16>
    %cst_9 = arith.constant dense<0.000000e+00> : vector<8x128xf32>
    %17 = tpu.matmul %15, %16, %cst_9 {dimension_numbers = #tpu.dot_dimension_numbers<[1], [0], [0], [1], [0, 0, 1, 1], [], []>} : vector<8x256xbf16>, vector<256x128xbf16>, vector<8x128xf32> -> vector<8x128xf32>
    %c0_10 = arith.constant 0 : index
    %c0_11 = arith.constant 0 : index
    %18 = vector.load %arg5[%c0_10, %c0_11] : memref<1x128xf32, #tpu.memory_space<vmem>>, vector<1x128xf32>
    %19 = vector.broadcast %18 : vector<1x128xf32> to vector<8x128xf32>
    %20 = arith.addf %17, %19 : vector<8x128xf32>
    %21 = arith.truncf %20 : vector<8x128xf32> to vector<8x128xbf16>
    %cst_12 = arith.constant 0.000000e+00 : bf16
    %22 = vector.broadcast %cst_12 : bf16 to vector<8x128xbf16>
    %23 = arith.subf %22, %21 : vector<8x128xbf16>
    %24 = math.exp %23 : vector<8x128xbf16>
    %25 = arith.extf %24 : vector<8x128xbf16> to vector<8x128xf32>
    %cst_13 = arith.constant 1.000000e+00 : f32
    %26 = vector.broadcast %cst_13 : f32 to vector<8x128xf32>
    %27 = arith.addf %26, %25 : vector<8x128xf32>
    %28 = tpu.reciprocal %27 {approx = true} : vector<8x128xf32> -> vector<8x128xf32>
    %29 = arith.truncf %28 : vector<8x128xf32> to vector<8x128xbf16>
    %c0_14 = arith.constant 0 : index
    %c0_15 = arith.constant 0 : index
    %30 = vector.load %arg6[%c0_14, %c0_15] : memref<128x128xbf16, #tpu.memory_space<vmem>>, vector<128x128xbf16>
    %cst_16 = arith.constant dense<0.000000e+00> : vector<8x128xf32>
    %31 = tpu.matmul %29, %30, %cst_16 {dimension_numbers = #tpu.dot_dimension_numbers<[1], [0], [0], [1], [0, 0, 1, 1], [], []>} : vector<8x128xbf16>, vector<128x128xbf16>, vector<8x128xf32> -> vector<8x128xf32>
    %c0_17 = arith.constant 0 : index
    %c0_18 = arith.constant 0 : index
    %32 = vector.load %arg7[%c0_17, %c0_18] : memref<1x128xf32, #tpu.memory_space<vmem>>, vector<1x128xf32>
    %33 = vector.broadcast %32 : vector<1x128xf32> to vector<8x128xf32>
    %34 = arith.addf %31, %33 : vector<8x128xf32>
    %35 = arith.truncf %34 : vector<8x128xf32> to vector<8x128xbf16>
    %cst_19 = arith.constant 0.000000e+00 : bf16
    %36 = vector.broadcast %cst_19 : bf16 to vector<8x128xbf16>
    %37 = arith.subf %36, %35 : vector<8x128xbf16>
    %38 = math.exp %37 : vector<8x128xbf16>
    %39 = arith.extf %38 : vector<8x128xbf16> to vector<8x128xf32>
    %cst_20 = arith.constant 1.000000e+00 : f32
    %40 = vector.broadcast %cst_20 : f32 to vector<8x128xf32>
    %41 = arith.addf %40, %39 : vector<8x128xf32>
    %42 = tpu.reciprocal %41 {approx = true} : vector<8x128xf32> -> vector<8x128xf32>
    %43 = arith.truncf %42 : vector<8x128xf32> to vector<8x128xbf16>
    %c0_21 = arith.constant 0 : index
    %c0_22 = arith.constant 0 : index
    %44 = vector.load %arg8[%c0_21, %c0_22] : memref<8x128xbf16, #tpu.memory_space<vmem>>, vector<8x128xbf16>
    %cst_23 = arith.constant dense<0.000000e+00> : vector<8x8xf32>
    %45 = tpu.matmul %44, %43, %cst_23 {dimension_numbers = #tpu.dot_dimension_numbers<[1], [1], [0], [0], [0, 0, 1, 0], [], []>} : vector<8x128xbf16>, vector<8x128xbf16>, vector<8x8xf32> -> vector<8x8xf32>
    %c0_24 = arith.constant 0 : index
    %c0_25 = arith.constant 0 : index
    %46 = vector.load %arg9[%c0_24, %c0_25] : memref<8x1xf32, #tpu.memory_space<vmem>>, vector<8x1xf32>
    %47 = vector.broadcast %46 : vector<8x1xf32> to vector<8x8xf32>
    %48 = arith.addf %45, %47 : vector<8x8xf32>
    %c0_26 = arith.constant 0 : index
    %c0_27 = arith.constant 0 : index
    %49 = vector.load %arg10[%c0_26, %c0_27] : memref<8x8xf32, #tpu.memory_space<vmem>>, vector<8x8xf32>
    tpu.vector_store %arg10[%c0_26, %c0_27], %48 {strides = array<i32>} : memref<8x8xf32, #tpu.memory_space<vmem>>, vector<8x8xf32>,
    return
  }
  func.func @transform_0(%arg0: i32) -> (i32, i32) {
    %c0_i32 = arith.constant 0 : i32
    %c0_i32_0 = arith.constant 0 : i32
    return %arg0, %c0_i32 : i32, i32
  }
  func.func @transform_1(%arg0: i32) -> (i32, i32) {
    %c0_i32 = arith.constant 0 : i32
    %c0_i32_0 = arith.constant 0 : i32
    %c0_i32_1 = arith.constant 0 : i32
    return %c0_i32, %c0_i32_0 : i32, i32
  }
  func.func @transform_2(%arg0: i32) -> (i32, i32) {
    %c0_i32 = arith.constant 0 : i32
    %c0_i32_0 = arith.constant 0 : i32
    %c0_i32_1 = arith.constant 0 : i32
    return %c0_i32, %c0_i32_0 : i32, i32
  }
  func.func @transform_3(%arg0: i32) -> (i32, i32) {
    %c0_i32 = arith.constant 0 : i32
    %c0_i32_0 = arith.constant 0 : i32
    %c0_i32_1 = arith.constant 0 : i32
    return %c0_i32, %c0_i32_0 : i32, i32
  }
  func.func @transform_4(%arg0: i32) -> (i32, i32) {
    %c0_i32 = arith.constant 0 : i32
    %c0_i32_0 = arith.constant 0 : i32
    %c0_i32_1 = arith.constant 0 : i32
    return %c0_i32, %c0_i32_0 : i32, i32
  }
  func.func @transform_5(%arg0: i32) -> (i32, i32) {
    %c0_i32 = arith.constant 0 : i32
    %c0_i32_0 = arith.constant 0 : i32
    %c0_i32_1 = arith.constant 0 : i32
    return %c0_i32, %c0_i32_0 : i32, i32
  }
  func.func @transform_6(%arg0: i32) -> (i32, i32) {
    %c0_i32 = arith.constant 0 : i32
    %c0_i32_0 = arith.constant 0 : i32
    %c0_i32_1 = arith.constant 0 : i32
    return %c0_i32, %c0_i32_0 : i32, i32
  }
  func.func @transform_7(%arg0: i32) -> (i32, i32) {
    %c0_i32 = arith.constant 0 : i32
    %c0_i32_0 = arith.constant 0 : i32
    %c0_i32_1 = arith.constant 0 : i32
    return %c0_i32, %c0_i32_0 : i32, i32
  }
  func.func @transform_8(%arg0: i32) -> (i32, i32) {
    %c0_i32 = arith.constant 0 : i32
    %c0_i32_0 = arith.constant 0 : i32
    %c0_i32_1 = arith.constant 0 : i32
    return %c0_i32, %c0_i32_0 : i32, i32
  }
  func.func @transform_9(%arg0: i32) -> (i32, i32) {
    %c0_i32 = arith.constant 0 : i32
    %c0_i32_0 = arith.constant 0 : i32
    return %c0_i32, %arg0 : i32, i32
  }
}

</mosaic_0001>

<bundles_post_ra>
// kernel: _qnet_forward_impl.1
= control target key start
LH: loop header
LB: loop body
LE: loop exit
PB: predicated region body
PF: predicated region fallthrough
CT: control target
= control target key end

     0   :  { %14 = vsyncpa [#allocation3], 0  ;;  %s781_s0 = inlined_call_operand.vmem [shape: f32[8,4], index: 0, kind: input, shape index: {}]   ;;  %s782_s1 = inlined_call_operand.vmem [shape: bf16[4,256], index: 1, kind: input, shape index: {}]   ;;  %s783_s2 = inlined_call_operand.vmem [shape: f32[1,256], index: 2, kind: input, shape index: {}]   ;;  %s784_s3 = inlined_call_operand.hbm [shape: bf16[256,128], index: 3, kind: input, shape index: {}]   ;;  %s785_s4 = inlined_call_operand.vmem [shape: f32[1,128], index: 4, kind: input, shape index: {}]   ;;  %s786_s5 = inlined_call_operand.hbm [shape: bf16[128,128], index: 5, kind: input, shape index: {}]   ;;  %s787_s6 = inlined_call_operand.vmem [shape: f32[1,128], index: 6, kind: input, shape index: {}]   ;;  %s788_s7 = inlined_call_operand.vmem [shape: bf16[8,128], index: 7, kind: input, shape index: {}]   ;;  %s789_s8 = inlined_call_operand.vmem [shape: f32[8,1], index: 8, kind: input, shape index: {}]   ;;  %s790_s9 = inlined_call_operand.vmem [shape: f32[8,8], index: 9, kind: output, shape index: {}]  }
   0x1   :  { %15 = vsyncpa [#allocation5], 0  ;;  %s694_s30 = smov [#allocation2]  }
   0x2   :  { %s27_s10 = sshll.u32 %s694_s30, 4  ;;  %s28_s10 = int_to_ptr.vmem [resolvable:$true] %s27_s10 }
   0x3   :  { %s658_s11 = scalar_lea.vmem %s28_s10, 2048  ;;  %p663_p1 = scmp.lt.s32.totalorder %s28_s10, %s28_s10 }
   0x4   :  { %p659_p0 = scmp.ne.s32.totalorder %s28_s10, %s658_s11  ;;  %p664_p2 = scmp.lt.s32.totalorder %s658_s11, %s658_s11 }
   0x6   :  { %p665_p3 = por %p664_p2, %p663_p1 }
   0x8   :  { %p666_p4 = pnand %p665_p3, %p659_p0 }
   0xa   :  { %669 = shalt.err (!%p666_p4)
}
   0xb   :  { %s695_s12 = smov 64   ;;  %s696_s13 = smov 4  }
   0xc   :  { %33 = dma.hbm_to_vmem [thread:$0]  %s784_s3, 2048, %s28_s10, [#allocation3], %s695_s12, %s695_s12, %s696_s13  }
   0xd   :  { %s697_s16 = smov [#allocation4]  }
   0xe   :  { %s41_s17 = sshll.u32 %s697_s16, 4  ;;  %s42_s17 = int_to_ptr.vmem [resolvable:$true] %s41_s17 }
   0xf   :  { %s678_s18 = scalar_lea.vmem %s42_s17, 1024  ;;  %p683_p6 = scmp.lt.s32.totalorder %s42_s17, %s42_s17 }
  0x10   :  { %p679_p5 = scmp.ne.s32.totalorder %s42_s17, %s678_s18  ;;  %p684_p7 = scmp.lt.s32.totalorder %s678_s18, %s678_s18 }
  0x12   :  { %p685_p8 = por %p684_p7, %p683_p6 }
  0x14   :  { %p686_p9 = pnand %p685_p8, %p679_p5 }
  0x16   :  { %689 = shalt.err (!%p686_p9)
}
  0x17   :  { %47 = dma.hbm_to_vmem [thread:$0]  %s786_s5, 1024, %s42_s17, [#allocation5], %s695_s12, %s695_s12, %s696_s13  }
  0x18   :  { %690 = dma.done.wait [#allocation3], 2048  }
  0x19   :  { %691 = vsyncadd [#allocation3], 4294965248 }
  0x1a   :  { %692 = dma.done.wait [#allocation5], 1024  }
  0x1b   :  { %693 = vsyncadd [#allocation5], 4294966272  ;;  %v698_v0 = vmov 0   ;;  %vm89_vm0 = vcmask 1041408   ;;  %v61_v2 = vld [vmem:[%s781_s0] sm:$0xff]  ;;  %vm85_vm1 = vcmask 31744   ;;  %v66_v22 = vlaneseq }
  0x1c   :  { %128 = vmatprep.mubr.bf16.mxu0 %v698_v0  ;;  %609 = vset.pattern.permute.xlu0 %v698_v0  ;;  %v514_v1 = vld.sshfl [vmem:[%s782_s1] sm:$0x33 pattern:$0x76325410]  ;;  %v62_v5 = vpack.c.bf16 %v61_v2, %v61_v2  ;;  %v610_v6 = vld [vmem:[#allocation2 + $0x78] sm:$0xff]   ;;  %v612_v8 = vld [vmem:[#allocation2 + $0x70] sm:$0xff]  }
  0x1d   :  { %v84_v3 = vcombine.high %v514_v1, %v514_v1  ;;  %v91_v4 = vsel %vm89_vm0, %v514_v1, 0  ;;  %v611_v7 = vld [vmem:[#allocation2 + $0x38] sm:$0xff]   ;;  %543 = vmatprep.subr.bf16.mxu1 %v610_v6  ;;  %v613_v9 = vld [vmem:[#allocation2 + $0x30] sm:$0xff]   ;;  %v614_v10 = vld [vmem:[#allocation2 + $0x68] sm:$0xff]   ;;  %v67_v23 = vshrl.u32 %v66_v22, 7  ;;  %v699_v52 = vmov 0.0  }
  0x1e   :  { %544 = vmatpush3.bf16.msra.mxu1 %v611_v7  ;;  %v615_v11 = vld [vmem:[#allocation2 + $0x28] sm:$0xff]   ;;  %v616_v12 = vld [vmem:[#allocation2 + $0x60] sm:$0xff]   ;;  %v618_v14 = vld [vmem:[#allocation2 + $0x58] sm:$0xff]   ;;  %vm700_vm2 = vmmov 0   ;;  %vm506_vm3 = vcmask 64512  }
  0x1f   :  { %515 = vmatprep.subr.msk.bf16.mxu0 %vm89_vm0, %v84_v3  ;;  %545 = vmatprep.subr.bf16.mxu1 %v612_v8  ;;  %v617_v13 = vld [vmem:[#allocation2 + $0x20] sm:$0xff]   ;;  %v619_v15 = vld [vmem:[#allocation2 + $0x18] sm:$0xff]   ;;  %v620_v16 = vld [vmem:[#allocation2 + $0x50] sm:$0xff]   ;;  %v68_v24 = vsub.s32 0, %v67_v23  ;;  %v72_v26 = vsub.s32 1, %v67_v23 }
  0x20   :  { %111 = vmatpush1.bf16.msra.mxu0 %v91_v4  ;;  %v621_v17 = vld [vmem:[#allocation2 + $0x10] sm:$0xff]   ;;  %v622_v18 = vld [vmem:[#allocation2 + $0x48] sm:$0xff]   ;;  %v624_v20 = vld [vmem:[#allocation2 + $0x40] sm:$0xff]  }
  0x21   :  { %v623_v19 = vld [vmem:[#allocation2 + $0x8] sm:$0xff]   ;;  %v625_v21 = vld [vmem:[#allocation2] sm:$0xff]   ;;  %v626_v51 = vld [vmem:[#allocation4 + $0x38] sm:$0xff]   ;;  %576 = vmatprep.subr.bf16.mxu0 %v699_v52 }
  0x22   :  { %546 = vmatpush3.bf16.msra.mxu1 %v613_v9  ;;  %v64_v25 = vld [vmem:[%s783_s2] sm:$0x3]  ;;  %v627_v53 = vld [vmem:[#allocation4 + $0x30] sm:$0xff]   ;;  %v628_v54 = vld [vmem:[#allocation4 + $0x28] sm:$0xff]  }
  0x23   :  { %516 = vmatmul.mubr.msk.bf16.vlgmr.msra.gmra.mxu0 %vm85_vm1, %v62_v5  ;;  %547 = vmatprep.subr.bf16.mxu1 %v614_v10  ;;  %v69_v27 = vrot.slane %v64_v25, %v68_v24  ;;  %v73_v28 = vrot.slane %v64_v25, %v72_v26  ;;  %v629_v55 = vld [vmem:[#allocation4 + $0x20] sm:$0xff]   ;;  %v630_v56 = vld [vmem:[#allocation4 + $0x18] sm:$0xff]   ;;  %v631_v57 = vld [vmem:[#allocation4 + $0x10] sm:$0xff]  }
  0x24   :  { %577 = vmatpush3.bf16.msra.mxu0 %v626_v51  ;;  %592 = vmatprep.mubr.msk.bf16.mxu0 %vm700_vm2, %v699_v52  ;;  %v632_v58 = vld [vmem:[#allocation4 + $0x8] sm:$0xff]   ;;  %v633_v59 = vld [vmem:[#allocation4] sm:$0xff]  }
  0x25   :  { %578 = vmatprep.subr.bf16.mxu0 %v699_v52  ;;  %v517_v61 = vld [vmem:[%s785_s4] ss:$0 sm:$0xff] }
  0x26   :  { %548 = vmatpush3.bf16.msra.mxu1 %v615_v11  ;;  %v460_v11 = vld [vmem:[%s789_s8] sm:$0xff] }
  0x27   :  { %549 = vmatprep.subr.bf16.mxu1 %v616_v12  ;;  %463 = vperm.xlu0 %609, %v460_v11   ;;  %v534_v12 = vld [vmem:[%s787_s6] ss:$0 sm:$0xff] }
  0x28   :  { %579 = vmatpush3.bf16.msra.mxu0 %v627_v53  ;;  %v459_v26 = vld [vmem:[%s788_s7] sm:$0xf] }
  0x29   :  { %580 = vmatprep.subr.bf16.mxu0 %v699_v52 }
  0x2a   :  { %550 = vmatpush3.bf16.msra.mxu1 %v617_v13 }
  0x2b   :  { %551 = vmatprep.subr.bf16.mxu1 %v618_v14 }
  0x2c   :  { %581 = vmatpush3.bf16.msra.mxu0 %v628_v54 }
  0x2d   :  { %582 = vmatprep.subr.bf16.mxu0 %v699_v52 }
  0x2e   :  { %552 = vmatpush3.bf16.msra.mxu1 %v619_v15 }
  0x2f   :  { %553 = vmatprep.subr.bf16.mxu1 %v620_v16 }
  0x30   :  { %583 = vmatpush3.bf16.msra.mxu0 %v629_v55 }
  0x31   :  { %584 = vmatprep.subr.bf16.mxu0 %v699_v52 }
  0x32   :  { %554 = vmatpush3.bf16.msra.mxu1 %v621_v17 }
  0x33   :  { %555 = vmatprep.subr.bf16.mxu1 %v622_v18 }
  0x34   :  { %585 = vmatpush3.bf16.msra.mxu0 %v630_v56 }
  0x35   :  { %586 = vmatprep.subr.bf16.mxu0 %v699_v52 }
  0x36   :  { %556 = vmatpush3.bf16.msra.mxu1 %v623_v19 }
  0x37   :  { %557 = vmatprep.subr.bf16.mxu1 %v624_v20 }
  0x38   :  { %587 = vmatpush3.bf16.msra.mxu0 %v631_v57 }
  0x39   :  { %588 = vmatprep.subr.bf16.mxu0 %v699_v52 }
  0x3a   :  { %558 = vmatpush3.bf16.msra.mxu1 %v625_v21 }
  0x3b   :  { %596 = vmatprep.subr.bf16.mxu1 %v699_v52 }
  0x3c   :  { %589 = vmatpush3.bf16.msra.mxu0 %v632_v58 }
  0x3d   :  { %590 = vmatprep.subr.bf16.mxu0 %v699_v52 }
  0x40   :  { %591 = vmatpush3.bf16.msra.mxu0 %v633_v59 }
  0xe3   :  { %v130_v29 = vpop.f32.mrf.mxu0 }
  0xe4   :  { %v131_v30 = vadd.f32 %v130_v29, %v69_v27  ;;  %v464_v27 = vpop.permute.xlu0 %463 }
  0xe5   :  { %v132_v31 = vpop.f32.mrf.mxu0 }
  0xe6   :  { %v137_v32 = vpack.c.bf16 %v131_v30, %v131_v30  ;;  %v133_v33 = vadd.f32 %v132_v31, %v73_v28 }
  0xe7   :  { %v134_v34 = vpop.f32.mrf.mxu0 }
  0xe8   :  { %v139_v35 = vsub.bf16 0, %v137_v32  ;;  %v138_v36 = vpack.c.bf16 %v133_v33, %v133_v33 }
  0xe9   :  { %v135_v37 = vpop.f32.mrf.mxu0 }
  0xea   :  { %v142_v38 = vmul.bf16 1069105081, %v139_v35  ;;  %v140_v39 = vsub.bf16 0, %v138_v36 }
  0xec   :  { %634 = vpow.bf16 %v142_v38  ;;  %v145_v40 = vmul.bf16 1069105081, %v140_v39 }
  0xee   :  { %636 = vpow.bf16 %v145_v40 }
  0xfa   :  { %v635_v41 = vpop.eup %634 }
  0xfb   :  { %v147_v42 = vunpack.c.l.bf16 %v635_v41 }
  0xfc   :  { %v637_v43 = vpop.eup %636 }
  0xfd   :  { %v149_v44 = vadd.f32 1.0, %v147_v42  ;;  %v148_v45 = vunpack.c.l.bf16 %v637_v43 }
  0xff   :  { %v150_v46 = vadd.f32 1.0, %v148_v45  ;;  %638 = vrcp.f32 %v149_v44 }
 0x101   :  { %640 = vrcp.f32 %v150_v46 }
 0x10c   :  { %v639_v47 = vpop.eup %638 }
 0x10d   :  { %v153_v50 = vpack.c.bf16 %v639_v47, %v639_v47 }
 0x10e   :  { %v641_v48 = vpop.eup %640 }
 0x10f   :  { %v154_v49 = vpack.c.bf16 %v641_v48, %v641_v48 }
 0x111   :  { %322 = vmatprep.mubr.bf16.mxu1 %v154_v49 }
 0x112   :  { %323 = vmatmul.mubr.bf16.vlgmr.msra.gmra.mxu1 %v153_v50 }
 0x113   :  { %598 = vmatprep.mubr.msk.bf16.mxu1 %vm700_vm2, %v699_v52 }
 0x1d2   :  { %v559_v60 = vpop.f32.mrf.mxu1 }
 0x1d4   :  { %v560_v62 = vpop.f32.mrf.mxu1 }
 0x1d5   :  { %v561_v63 = vadd.f32 %v560_v62, %v559_v60 }
 0x1d6   :  { %v562_v0 = vpop.f32.mrf.mxu1 }
 0x1d7   :  { %v325_v1 = vadd.f32 %v561_v63, %v517_v61 }
 0x1d8   :  { %v563_v2 = vpop.f32.mrf.mxu1 }
 0x1d9   :  { %v330_v3 = vpack.c.bf16 %v325_v1, %v325_v1 }
 0x1db   :  { %v331_v4 = vsub.bf16 0, %v330_v3 }
 0x1dd   :  { %v333_v5 = vmul.bf16 1069105081, %v331_v4 }
 0x1df   :  { %642 = vpow.bf16 %v333_v5 }
 0x1ed   :  { %v643_v6 = vpop.eup %642 }
 0x1ee   :  { %v335_v7 = vunpack.c.l.bf16 %v643_v6 }
 0x1f0   :  { %v336_v8 = vadd.f32 1.0, %v335_v7 }
 0x1f2   :  { %644 = vrcp.f32 %v336_v8 }
 0x1ff   :  { %v645_v9 = vpop.eup %644 }
 0x200   :  { %v338_v10 = vpack.c.bf16 %v645_v9, %v645_v9 }
 0x202   :  { %593 = vmatmul.mubr.bf16.vlgmr.msra.gmra.mxu0 %v338_v10 }
 0x2c2   :  { %v444_v13 = vpop.f32.mrf.mxu0 }
 0x2c3   :  { %v445_v14 = vadd.f32 %v534_v12, %v444_v13 }
 0x2c4   :  { %v594_v15 = vpop.f32.mrf.mxu0 }
 0x2c5   :  { %v450_v16 = vpack.c.bf16 %v445_v14, %v445_v14 }
 0x2c6   :  { %v447_v17 = vpop.f32.mrf.mxu0 }
 0x2c7   :  { %v451_v18 = vsub.bf16 0, %v450_v16 }
 0x2c8   :  { %v595_v19 = vpop.f32.mrf.mxu0 }
 0x2c9   :  { %v453_v20 = vmul.bf16 1069105081, %v451_v18 }
 0x2cb   :  { %646 = vpow.bf16 %v453_v20 }
 0x2d9   :  { %v647_v21 = vpop.eup %646 }
 0x2da   :  { %v455_v22 = vunpack.c.l.bf16 %v647_v21 }
 0x2dc   :  { %v456_v23 = vadd.f32 1.0, %v455_v22 }
 0x2de   :  { %648 = vrcp.f32 %v456_v23 }
 0x2eb   :  { %v649_v24 = vpop.eup %648 }
 0x2ec   :  { %v458_v25 = vpack.c.bf16 %v649_v24, %v649_v24 }
 0x2ee   :  { %597 = vmatpush3.bf16.xpose.msra.mxu1 %v458_v25 }
 0x2f5   :  { %599 = vmatmul.mubr.bf16.vlgmr.msra.gmra.mxu1 %v459_v26 }
 0x3b5   :  { %v500_v28 = vpop.f32.mrf.mxu1 }
 0x3b6   :  { %v501_v29 = vadd.f32 %v500_v28, %v464_v27 }
 0x3b7   :  { %v600_v30 = vpop.f32.mrf.mxu1 }
 0x3b8   :  { %507 = vst.msk [vmem:[%s790_s9] sm:$0xff] %vm506_vm3, %v501_v29 }
 0x3b9   :  { %v503_v31 = vpop.f32.mrf.mxu1 }
 0x3bb   :  { %v601_v32 = vpop.f32.mrf.mxu1 }
 0x3bc   :  { %512 = vsyncpa [#allocation3], 1 }
 0x3bd   :  { %513 = vsyncpa [#allocation5], 1 }

</bundles_post_ra>
